<compile_context>
chip_gen: v5e
topology: v5e:2x2
jax: 0.10.0
libtpu: 0.0.40
codegen_flags: <defaults>
</compile_context>

<pallas_src>
import functools
import math

import jax
import jax.numpy as jnp
from jax.experimental import pallas as pl
from jax.experimental.pallas import tpu as pltpu


def _round_up(x: int, m: int) -> int:
    return ((x + m - 1) // m) * m


def encoder_kernel(x_ref, w_in_ref, b_in_ref, w_mv_ref, b_mv_ref, eps_ref,
                   out_ref, *, latent_dim: int):
    """One batch tile: fused FC_input+ReLU, fused mean/var head, reparameterization.

    Output layout (lane axis, width 3*L): [ z (L) | mean (L) | log_var (L) ].
    """
    L = latent_dim

    # FC_input + ReLU  (bf16 MXU inputs, f32 accumulation, f32 bias/epilogue).
    x = x_ref[...]                                                      # (TB, input_dim) bf16
    h = jnp.dot(x, w_in_ref[...], preferred_element_type=jnp.float32) + b_in_ref[...]
    h = jnp.maximum(h, 0.0)

    # Fused mean|log_var head: one matmul over the packed [input_dim/H, HEAD_P] weight.
    mv = jnp.dot(h.astype(w_mv_ref.dtype), w_mv_ref[...],
                 preferred_element_type=jnp.float32) + b_mv_ref[...]    # (TB, HEAD_P) f32

    mean = mv[:, :L]
    log_var = mv[:, L:2 * L]

    # Reparameterization: z = mean + exp(0.5 * log_var) * eps.
    std = jnp.exp(0.5 * log_var)
    z = mean + std * eps_ref[...]

    # Single full-block store of the packed [z | mean | log_var] slab.
    out_ref[...] = jnp.concatenate([z, mean, log_var], axis=-1)


def encoder_forward(x, params, eps, *, block_b: int = 512):
    """x: [B, input_dim] f32; params: dict of [in,out] weights / [1,out] biases (f32);
    eps: [B, latent_dim] f32.  Returns (z, mean, log_var) each [B, latent_dim] f32."""
    B, input_dim = x.shape
    hidden_dim = params["w_in"].shape[1]
    latent_dim = params["w_mean"].shape[1]

    # Lane-aligned padded output dims of the matmuls (contraction dims stay unpadded).
    H_P = _round_up(hidden_dim, 128)
    HEAD_P = _round_up(2 * latent_dim, 128)    # fused mean|logvar head width
    OUT_W = 3 * latent_dim                     # packed output slab width (no lane padding)

    # --- Balanced batch tiling (TB multiple of 16 for bf16 sublane packing). ---
    n_tiles = max(1, math.ceil(B / block_b))
    if n_tiles == 1 and B > 16:
        n_tiles = 2                            # keep both v7x TensorCores busy
    TB = _round_up(math.ceil(B / n_tiles), 16)
    B_P = _round_up(B, TB)
    grid = (B_P // TB,)

    bf16 = jnp.bfloat16
    f32 = jnp.float32

    # --- Pack / zero-pad parameters (bf16 matmul inputs, f32 biases). ---
    w_in = jnp.zeros((input_dim, H_P), bf16).at[:, :hidden_dim].set(
        params["w_in"].astype(bf16))
    b_in = jnp.zeros((1, H_P), f32).at[:, :hidden_dim].set(params["b_in"])

    w_mv = jnp.zeros((H_P, HEAD_P), bf16)
    w_mv = w_mv.at[:hidden_dim, :latent_dim].set(params["w_mean"].astype(bf16))
    w_mv = w_mv.at[:hidden_dim, latent_dim:2 * latent_dim].set(params["w_var"].astype(bf16))
    b_mv = jnp.zeros((1, HEAD_P), f32)
    b_mv = b_mv.at[:, :latent_dim].set(params["b_mean"])
    b_mv = b_mv.at[:, latent_dim:2 * latent_dim].set(params["b_var"])

    # --- Pad activations / noise along the batch dim only (no feature padding on x). ---
    x_p = jnp.zeros((B_P, input_dim), bf16).at[:B].set(x.astype(bf16))
    eps_p = jnp.zeros((B_P, latent_dim), f32).at[:B].set(eps)

    # --- Cost estimate + VMEM budget from the actual footprint. ---
    flops = 2 * B * (input_dim * hidden_dim + hidden_dim * 2 * latent_dim)
    bytes_accessed = (x_p.size * 2 + w_in.size * 2 + w_mv.size * 2 +
                      b_in.size * 4 + b_mv.size * 4 + eps_p.size * 4 + B_P * OUT_W * 4)

    tile_io = TB * input_dim * 2 + TB * latent_dim * 4 + TB * OUT_W * 4
    resident = w_in.size * 2 + w_mv.size * 2 + (b_in.size + b_mv.size) * 4
    vmem_est = 2 * tile_io + 2 * resident + 6 * TB * H_P * 4   # dbl-buffered IO + temps
    vmem_limit = int(min(64 * 1024 * 1024,
                         max(8 * 1024 * 1024, _round_up(vmem_est, 1 << 20) + (4 << 20))))

    out = pl.pallas_call(
        functools.partial(encoder_kernel, latent_dim=latent_dim),
        out_shape=jax.ShapeDtypeStruct((B_P, OUT_W), f32),
        grid=grid,
        in_specs=[
            pl.BlockSpec((TB, input_dim), lambda i: (i, 0)),     # x tile (no lane padding)
            pl.BlockSpec((input_dim, H_P), lambda i: (0, 0)),    # W_in   (VMEM-resident)
            pl.BlockSpec((1, H_P), lambda i: (0, 0)),            # b_in
            pl.BlockSpec((H_P, HEAD_P), lambda i: (0, 0)),       # W_mean|W_var fused
            pl.BlockSpec((1, HEAD_P), lambda i: (0, 0)),         # b_mean|b_var fused
            pl.BlockSpec((TB, latent_dim), lambda i: (i, 0)),    # eps tile
        ],
        out_specs=pl.BlockSpec((TB, OUT_W), lambda i: (i, 0)),
        compiler_params=pltpu.CompilerParams(
            dimension_semantics=("parallel",),
            vmem_limit_bytes=vmem_limit,
        ),
        cost_estimate=pl.CostEstimate(
            flops=flops,
            transcendentals=B * latent_dim,
            bytes_accessed=bytes_accessed,
        ),
    )(x_p, w_in, b_in, w_mv, b_mv, eps_p)

    z = out[:B, 0:latent_dim]
    mean = out[:B, latent_dim:2 * latent_dim]
    log_var = out[:B, 2 * latent_dim:3 * latent_dim]
    return z, mean, log_var


def init_params(key, input_dim, hidden_dim, latent_dim):
    """Deterministic synthetic init. Weights stored as [in, out] (PyTorch Linear weight transposed)."""
    k1, k2, k3, k4, k5, k6 = jax.random.split(key, 6)

    def lin(kw, kb, fan_in, fan_out):
        bound = 1.0 / jnp.sqrt(fan_in)
        w = jax.random.uniform(kw, (fan_in, fan_out), jnp.float32, -bound, bound)
        b = jax.random.uniform(kb, (1, fan_out), jnp.float32, -bound, bound)
        return w, b

    w_in, b_in = lin(k1, k2, input_dim, hidden_dim)
    w_m, b_m = lin(k3, k4, hidden_dim, latent_dim)
    w_v, b_v = lin(k5, k6, hidden_dim, latent_dim)
    return {"w_in": w_in, "b_in": b_in,
            "w_mean": w_m, "b_mean": b_m,
            "w_var": w_v, "b_var": b_v}


if __name__ == "__main__":
    # Small shapes consistent with the module's forward (x: [batch, input_dim]).
    B, INPUT_DIM, HIDDEN_DIM, LATENT_DIM = 8, 64, 32, 16

    root = jax.random.PRNGKey(0)
    k_x, k_p, k_eps = jax.random.split(root, 3)

    x = jax.random.normal(k_x, (B, INPUT_DIM), jnp.float32)
    params = init_params(k_p, INPUT_DIM, HIDDEN_DIM, LATENT_DIM)
    # TODO(synk): torch.randn_like draws epsilon inside the module; here it is drawn
    # deterministically in the wrapper with jax.random and fed to the kernel.
    eps = jax.random.normal(k_eps, (B, LATENT_DIM), jnp.float32)

    z, mean, log_var = encoder_forward(x, params, eps)
    jax.block_until_ready((z, mean, log_var))

    # Pure-JAX reference with matching bf16 matmul inputs / f32 accumulation.
    bf = jnp.bfloat16
    h_ref = jnp.maximum(
        jnp.dot(x.astype(bf), params["w_in"].astype(bf),
                preferred_element_type=jnp.float32) + params["b_in"], 0.0)
    hb = h_ref.astype(bf)
    mean_ref = jnp.dot(hb, params["w_mean"].astype(bf),
                       preferred_element_type=jnp.float32) + params["b_mean"]
    logvar_ref = jnp.dot(hb, params["w_var"].astype(bf),
                         preferred_element_type=jnp.float32) + params["b_var"]
    z_ref = mean_ref + jnp.exp(0.5 * logvar_ref) * eps

    assert jnp.allclose(mean, mean_ref, atol=1e-3, rtol=1e-3)
    assert jnp.allclose(log_var, logvar_ref, atol=1e-3, rtol=1e-3)
    assert jnp.allclose(z, z_ref, atol=1e-3, rtol=1e-3)

    print("KERNEL_OK")
</pallas_src>

<mosaic_0001>
module attributes {stable_mosaic.version = 11 : i64} {
  func.func @encoder_kernel(%arg0: i32, %arg1: memref<16x64xbf16, #tpu.memory_space<vmem>>, %arg2: memref<64x128xbf16, #tpu.memory_space<vmem>>, %arg3: memref<1x128xf32, #tpu.memory_space<vmem>>, %arg4: memref<128x128xbf16, #tpu.memory_space<vmem>>, %arg5: memref<1x128xf32, #tpu.memory_space<vmem>>, %arg6: memref<16x16xf32, #tpu.memory_space<vmem>>, %arg7: memref<16x48xf32, #tpu.memory_space<vmem>>) attributes {dimension_semantics = [#tpu.dimension_semantics<parallel>], iteration_bounds = array<i64: 1>, scalar_prefetch = 0 : i64, scratch_operands = 0 : i64, tpu.core_type = #tpu.core_type<tc>, window_params = [{transform_indices = @transform_0, window_bounds = array<i64: 16, 64>}, {pipeline_mode = #tpu.pipeline_mode<synchronous>, transform_indices = @transform_1, window_bounds = array<i64: 64, 128>}, {pipeline_mode = #tpu.pipeline_mode<synchronous>, transform_indices = @transform_2, window_bounds = array<i64: 1, 128>}, {pipeline_mode = #tpu.pipeline_mode<synchronous>, transform_indices = @transform_3, window_bounds = array<i64: 128, 128>}, {pipeline_mode = #tpu.pipeline_mode<synchronous>, transform_indices = @transform_4, window_bounds = array<i64: 1, 128>}, {transform_indices = @transform_5, window_bounds = array<i64: 16, 16>}, {transform_indices = @transform_6, window_bounds = array<i64: 16, 48>}]} {
    %c0 = arith.constant 0 : index
    %c0_0 = arith.constant 0 : index
    %0 = vector.load %arg1[%c0, %c0_0] : memref<16x64xbf16, #tpu.memory_space<vmem>>, vector<16x64xbf16>
    %c0_1 = arith.constant 0 : index
    %c0_2 = arith.constant 0 : index
    %1 = vector.load %arg2[%c0_1, %c0_2] : memref<64x128xbf16, #tpu.memory_space<vmem>>, vector<64x128xbf16>
    %cst = arith.constant dense<0.000000e+00> : vector<16x128xf32>
    %2 = tpu.matmul %0, %1, %cst {dimension_numbers = #tpu.dot_dimension_numbers<[1], [0], [0], [1], [0, 0, 1, 1], [], []>} : vector<16x64xbf16>, vector<64x128xbf16>, vector<16x128xf32> -> vector<16x128xf32>
    %c0_3 = arith.constant 0 : index
    %c0_4 = arith.constant 0 : index
    %3 = vector.load %arg3[%c0_3, %c0_4] : memref<1x128xf32, #tpu.memory_space<vmem>>, vector<1x128xf32>
    %4 = vector.broadcast %3 : vector<1x128xf32> to vector<16x128xf32>
    %5 = arith.addf %2, %4 : vector<16x128xf32>
    %cst_5 = arith.constant 0.000000e+00 : f32
    %6 = vector.broadcast %cst_5 : f32 to vector<16x128xf32>
    %7 = arith.maximumf %5, %6 : vector<16x128xf32>
    %8 = arith.truncf %7 : vector<16x128xf32> to vector<16x128xbf16>
    %c0_6 = arith.constant 0 : index
    %c0_7 = arith.constant 0 : index
    %9 = vector.load %arg4[%c0_6, %c0_7] : memref<128x128xbf16, #tpu.memory_space<vmem>>, vector<128x128xbf16>
    %cst_8 = arith.constant dense<0.000000e+00> : vector<16x128xf32>
    %10 = tpu.matmul %8, %9, %cst_8 {dimension_numbers = #tpu.dot_dimension_numbers<[1], [0], [0], [1], [0, 0, 1, 1], [], []>} : vector<16x128xbf16>, vector<128x128xbf16>, vector<16x128xf32> -> vector<16x128xf32>
    %c0_9 = arith.constant 0 : index
    %c0_10 = arith.constant 0 : index
    %11 = vector.load %arg5[%c0_9, %c0_10] : memref<1x128xf32, #tpu.memory_space<vmem>>, vector<1x128xf32>
    %12 = vector.broadcast %11 : vector<1x128xf32> to vector<16x128xf32>
    %13 = arith.addf %10, %12 : vector<16x128xf32>
    %14 = vector.extract_strided_slice %13 {offsets = [0, 0], sizes = [16, 16], strides = [1, 1]} : vector<16x128xf32> to vector<16x16xf32>
    %15 = vector.extract_strided_slice %13 {offsets = [0, 16], sizes = [16, 16], strides = [1, 1]} : vector<16x128xf32> to vector<16x16xf32>
    %cst_11 = arith.constant 5.000000e-01 : f32
    %16 = vector.broadcast %cst_11 : f32 to vector<16x16xf32>
    %17 = arith.mulf %16, %15 : vector<16x16xf32>
    %18 = math.exp %17 : vector<16x16xf32>
    %c0_12 = arith.constant 0 : index
    %c0_13 = arith.constant 0 : index
    %19 = vector.load %arg6[%c0_12, %c0_13] : memref<16x16xf32, #tpu.memory_space<vmem>>, vector<16x16xf32>
    %20 = arith.mulf %18, %19 : vector<16x16xf32>
    %21 = arith.addf %14, %20 : vector<16x16xf32>
    %22 = tpu.concatenate %21, %14, %15 in 1 : vector<16x16xf32>, vector<16x16xf32>, vector<16x16xf32> -> vector<16x48xf32>
    %c0_14 = arith.constant 0 : index
    %c0_15 = arith.constant 0 : index
    %23 = vector.load %arg7[%c0_14, %c0_15] : memref<16x48xf32, #tpu.memory_space<vmem>>, vector<16x48xf32>
    tpu.vector_store %arg7[%c0_14, %c0_15], %22 {strides = array<i32>} : memref<16x48xf32, #tpu.memory_space<vmem>>, vector<16x48xf32>,
    return
  }
  func.func @transform_0(%arg0: i32) -> (i32, i32) {
    %c0_i32 = arith.constant 0 : i32
    %c0_i32_0 = arith.constant 0 : i32
    return %arg0, %c0_i32 : i32, i32
  }
  func.func @transform_1(%arg0: i32) -> (i32, i32) {
    %c0_i32 = arith.constant 0 : i32
    %c0_i32_0 = arith.constant 0 : i32
    %c0_i32_1 = arith.constant 0 : i32
    return %c0_i32, %c0_i32_0 : i32, i32
  }
  func.func @transform_2(%arg0: i32) -> (i32, i32) {
    %c0_i32 = arith.constant 0 : i32
    %c0_i32_0 = arith.constant 0 : i32
    %c0_i32_1 = arith.constant 0 : i32
    return %c0_i32, %c0_i32_0 : i32, i32
  }
  func.func @transform_3(%arg0: i32) -> (i32, i32) {
    %c0_i32 = arith.constant 0 : i32
    %c0_i32_0 = arith.constant 0 : i32
    %c0_i32_1 = arith.constant 0 : i32
    return %c0_i32, %c0_i32_0 : i32, i32
  }
  func.func @transform_4(%arg0: i32) -> (i32, i32) {
    %c0_i32 = arith.constant 0 : i32
    %c0_i32_0 = arith.constant 0 : i32
    %c0_i32_1 = arith.constant 0 : i32
    return %c0_i32, %c0_i32_0 : i32, i32
  }
  func.func @transform_5(%arg0: i32) -> (i32, i32) {
    %c0_i32 = arith.constant 0 : i32
    %c0_i32_0 = arith.constant 0 : i32
    return %arg0, %c0_i32 : i32, i32
  }
  func.func @transform_6(%arg0: i32) -> (i32, i32) {
    %c0_i32 = arith.constant 0 : i32
    %c0_i32_0 = arith.constant 0 : i32
    return %arg0, %c0_i32 : i32, i32
  }
}

</mosaic_0001>

<bundles_post_ra>
// kernel: tpu_custom_call.1
= control target key start
LH: loop header
LB: loop body
LE: loop exit
PB: predicated region body
PF: predicated region fallthrough
CT: control target
= control target key end

     0   :  { %11 = vsyncpa [#allocation3], 0  ;;  %s584_s0 = inlined_call_operand.hbm [shape: bf16[16,64], index: 0, kind: input, shape index: {}]   ;;  %s585_s1 = inlined_call_operand.hbm [shape: bf16[64,128], index: 1, kind: input, shape index: {}]   ;;  %s586_s2 = inlined_call_operand.vmem [shape: f32[1,128], index: 2, kind: input, shape index: {}]   ;;  %s587_s3 = inlined_call_operand.hbm [shape: bf16[128,128], index: 3, kind: input, shape index: {}]   ;;  %s588_s4 = inlined_call_operand.vmem [shape: f32[1,128], index: 4, kind: input, shape index: {}]   ;;  %s589_s5 = inlined_call_operand.hbm [shape: f32[16,16], index: 5, kind: input, shape index: {}]   ;;  %s590_s6 = inlined_call_operand.hbm [shape: f32[16,48], index: 6, kind: output, shape index: {}]  }
   0x1   :  { %12 = vsyncpa [#allocation6], 0 }
   0x2   :  { %13 = vsyncpa [#allocation9], 0 }
   0x3   :  { %14 = vsyncpa [#allocation4], 0  ;;  %s32_s23 = sshll.u32 %s585_s1, 4  ;;  %s511_s24 = smov [#allocation5]   ;;  %s33_s23 = int_to_ptr.hbm [resolvable:$true] %s32_s23 }
   0x4   :  { %s34_s25 = sshll.u32 %s511_s24, 4  ;;  %s19_s28 = sshll.u32 %s584_s0, 4  ;;  %s35_s25 = int_to_ptr.vmem [resolvable:$true] %s34_s25  ;;  %s20_s28 = int_to_ptr.hbm [resolvable:$true] %s19_s28 }
   0x5   :  { %s512_s29 = smov 64   ;;  %s513_s30 = smov 4  }
   0x6   :  { %40 = dma.hbm_to_vmem [thread:$0]  %s33_s23, 512, %s35_s25, [#allocation6], %s512_s29, %s512_s29, %s513_s30  }
   0x7   :  { %s514_s7 = smov [#allocation2]   ;;  %s47_s11 = sshll.u32 %s587_s3, 4  ;;  %s48_s11 = int_to_ptr.hbm [resolvable:$true] %s47_s11 }
   0x8   :  { %s21_s8 = sshll.u32 %s514_s7, 4  ;;  %s62_s13 = sshll.u32 %s589_s5, 4  ;;  %s22_s8 = int_to_ptr.vmem [resolvable:$true] %s21_s8  ;;  %s63_s13 = int_to_ptr.hbm [resolvable:$true] %s62_s13 }
   0x9   :  { %27 = dma.hbm_to_vmem [thread:$0]  %s20_s28, 128, %s22_s8, [#allocation3], %s512_s29, %s512_s29, %s513_s30  }
   0xa   :  { %s515_s14 = smov [#allocation7]   ;;  %s516_s0 = smov [#allocation8]  }
   0xb   :  { %s49_s15 = sshll.u32 %s515_s14, 4  ;;  %s64_s16 = sshll.u32 %s516_s0, 4  ;;  %s50_s15 = int_to_ptr.vmem [resolvable:$true] %s49_s15  ;;  %s65_s16 = int_to_ptr.vmem [resolvable:$true] %s64_s16 }
   0xc   :  { %55 = dma.hbm_to_vmem [thread:$0]  %s48_s11, 1024, %s50_s15, [#allocation6], %s512_s29, %s512_s29, %s513_s30  }
   0xd   :  { %s517_s17 = smov 128   ;;  %s518_s18 = smov 8  }
   0xe   :  { %70 = dma.hbm_to_vmem [thread:$0]  %s63_s13, 256, %s65_s16, [#allocation9], %s517_s17, %s517_s17, %s518_s18  }
   0xf   :  { %503 = dma.done.wait [#allocation3], 128  }
  0x10   :  { %504 = vsyncadd [#allocation3], 4294967168 }
  0x11   :  { %505 = dma.done.wait [#allocation6], 1536  }
  0x12   :  { %506 = vsyncadd [#allocation6], 4294965760 }
  0x13   :  { %507 = dma.done.wait [#allocation9], 256  }
  0x14   :  { %508 = vsyncadd [#allocation9], 4294967040  ;;  %v357_v0 = vld [vmem:[#allocation5 + $0x18] sm:$0xff]  ;;  %v356_v2 = vld [vmem:[#allocation5 + $0x10] sm:$0xff]  ;;  %vm131_vm0 = vcmask 523264   ;;  %s519_s3 = smov 16  }
  0x15   :  { %v365_v1 = vld [vmem:[#allocation7 + $0x38] sm:$0xff]  ;;  %139 = vmatpush.bf16.msra.mxu0 %v357_v0  ;;  %v364_v3 = vld [vmem:[#allocation7 + $0x30] sm:$0xff]  ;;  %v355_v4 = vld [vmem:[#allocation5 + $0x8] sm:$0xff]  ;;  %vm270_vm1 = vcmask 130048   ;;  %vm273_vm2 = vcmask 261120   ;;  %vm276_vm3 = vcmask 392192  }
  0x16   :  { %220 = vmatpush.bf16.msra.mxu1 %v365_v1  ;;  %v363_v5 = vld [vmem:[#allocation7 + $0x28] sm:$0xff]  ;;  %v354_v6 = vld [vmem:[#allocation5] sm:$0xff]  ;;  %v353_v8 = vld [vmem:[#allocation2] sm:$0xff]  ;;  %s285_s25 = sshll.u32 %s590_s6, 4  ;;  %s286_s25 = int_to_ptr.hbm [resolvable:$true] %s285_s25 }
  0x17   :  { %v362_v7 = vld [vmem:[#allocation7 + $0x20] sm:$0xff]  ;;  %v361_v9 = vld [vmem:[#allocation7 + $0x18] sm:$0xff]  ;;  %v360_v10 = vld [vmem:[#allocation7 + $0x10] sm:$0xff] }
  0x18   :  { %v359_v11 = vld [vmem:[#allocation7 + $0x8] sm:$0xff]  ;;  %v358_v12 = vld [vmem:[#allocation7] sm:$0xff]  ;;  %v377_v16 = vld [vmem:[%s586_s2] ss:$0 sm:$0xff]  ;;  %s520_s2 = smov 112  }
  0x19   :  { %140 = vmatpush.bf16.msra.mxu0 %v356_v2  ;;  %v240_v13 = vld [vmem:[#allocation8] sm:$0xff]  ;;  %v241_v14 = vld [vmem:[#allocation8 + $0x8] sm:$0xff]  ;;  %v378_v23 = vld [vmem:[%s588_s4] ss:$0 sm:$0xff]  ;;  %s521_s4 = smov [#allocation10]  }
  0x1a   :  { %221 = vmatpush.bf16.msra.mxu1 %v364_v3  ;;  %244 = vrot.lane.b32.xlu0 %v240_v13, %s519_s3  ;;  %s283_s22 = sshll.u32 %s521_s4, 4  ;;  %s284_s22 = int_to_ptr.vmem [resolvable:$true] %s283_s22 }
  0x1d   :  { %141 = vmatpush.bf16.msra.mxu0 %v355_v4 }
  0x1e   :  { %222 = vmatpush.bf16.msra.mxu1 %v363_v5 }
  0x21   :  { %142 = vmatpush.bf16.msra.mxu0 %v354_v6 }
  0x22   :  { %223 = vmatpush.bf16.msra.mxu1 %v362_v7  ;;  %246 = vrot.lane.b32.xlu0 %v241_v14, %s519_s3 }
  0x24   :  { %320 = vmatmul.msk.bf16.vlgmr.msra.gmra.mxu0 %vm131_vm0, %v353_v8 }
  0x26   :  { %224 = vmatpush.bf16.msra.mxu1 %v361_v9 }
  0x2a   :  { %225 = vmatpush.bf16.msra.mxu1 %v360_v10 }
  0x2e   :  { %226 = vmatpush.bf16.msra.mxu1 %v359_v11 }
  0x32   :  { %227 = vmatpush.bf16.msra.mxu1 %v358_v12 }
  0x8c   :  { %v245_v30 = vpop.permute.xlu0 %244 }
  0x94   :  { %v247_v35 = vpop.permute.xlu0 %246 }
  0xa1   :  { %v144_v15 = vpop.f32.mrf.mxu0 }
  0xa2   :  { %v145_v17 = vadd.f32 %v377_v16, %v144_v15 }
  0xa4   :  { %v149_v20 = vmax.f32 %v145_v17, 0.0 }
  0xa9   :  { %v146_v18 = vpop.f32.mrf.mxu0 }
  0xaa   :  { %v147_v19 = vadd.f32 %v377_v16, %v146_v18 }
  0xac   :  { %v150_v21 = vmax.f32 %v147_v19, 0.0 }
  0xae   :  { %v151_v22 = vpack.c.bf16 %v150_v21, %v149_v20 }
  0xb0   :  { %228 = vmatmul.bf16.vlgmr.msra.gmra.mxu1 %v151_v22 }
 0x12d   :  { %v229_v24 = vpop.f32.mrf.mxu1 }
 0x12e   :  { %v230_v25 = vadd.f32 %v378_v23, %v229_v24 }
 0x130   :  { %v234_v26 = vmul.f32 0.5, %v230_v25  ;;  %264 = vrot.lane.b32.xlu2 %v230_v25, %s519_s3 }
 0x132   :  { %v236_v27 = vmul.f32 1.442695, %v234_v26 }
 0x134   :  { %379 = vpow2.f32 %v236_v27 }
 0x135   :  { %v231_v28 = vpop.f32.mrf.mxu1 }
 0x136   :  { %v232_v29 = vadd.f32 %v378_v23, %v231_v28 }
 0x138   :  { %v235_v31 = vmul.f32 0.5, %v232_v29  ;;  %266 = vrot.lane.b32.xlu2 %v232_v29, %s519_s3 }
 0x13a   :  { %v380_v32 = vpop.eup %379  ;;  %v238_v33 = vmul.f32 1.442695, %v235_v31 }
 0x13b   :  { %v250_v34 = vmul.f32 %v380_v32, %v245_v30 }
 0x13c   :  { %381 = vpow2.f32 %v238_v33 }
 0x13d   :  { %254 = vrot.lane.b32.xlu1 %v250_v34, %s520_s2 }
 0x142   :  { %v382_v36 = vpop.eup %381 }
 0x143   :  { %v251_v37 = vmul.f32 %v382_v36, %v247_v35 }
 0x145   :  { %256 = vrot.lane.b32.xlu1 %v251_v37, %s520_s2 }
 0x18a   :  { %v265_v38 = vpop.permute.xlu2 %264 }
 0x192   :  { %v267_v45 = vpop.permute.xlu2 %266 }
 0x1af   :  { %v255_v39 = vpop.permute.xlu1 %254 }
 0x1b0   :  { %v260_v40 = vadd.f32 %v255_v39, %v230_v25 }
 0x1b2   :  { %v271_v41 = vsel %vm270_vm1, %v260_v40, %v265_v38 }
 0x1b3   :  { %v274_v42 = vsel %vm273_vm2, %v271_v41, %v265_v38 }
 0x1b4   :  { %277 = vst.msk [vmem:[#allocation10] sm:$0xff] %vm276_vm3, %v274_v42 }
 0x1b7   :  { %v257_v43 = vpop.permute.xlu1 %256 }
 0x1b8   :  { %v261_v44 = vadd.f32 %v257_v43, %v232_v29 }
 0x1ba   :  { %v272_v46 = vsel %vm270_vm1, %v261_v44, %v267_v45 }
 0x1bb   :  { %v275_v47 = vsel %vm273_vm2, %v272_v46, %v267_v45 }
 0x1bc   :  { %278 = vst.msk [vmem:[#allocation10 + $0x8] sm:$0xff] %vm276_vm3, %v275_v47 }
 0x1bd   :  { %291 = dma.vmem_to_hbm [thread:$0]  %s284_s22, 256, %s286_s25, [#allocation4], %s517_s17, %s517_s17, %s518_s18  }
 0x1be   :  { %509 = dma.done.wait [#allocation4], 256  }
 0x1bf   :  { %510 = vsyncadd [#allocation4], 4294967040 }
 0x1c0   :  { %296 = vsyncpa [#allocation3], 1 }
 0x1c1   :  { %297 = vsyncpa [#allocation6], 1 }
 0x1c2   :  { %298 = vsyncpa [#allocation9], 1 }
 0x1c3   :  { %299 = vsyncpa [#allocation4], 1 }

</bundles_post_ra>
